<compile_context>
chip_gen: v6e
topology: v6e:2x2x1
jax: 0.10.0
libtpu: 0.0.40
codegen_flags: <defaults>
</compile_context>

<pallas_src>
import jax
import jax.numpy as jnp
from jax.experimental import pallas as pl
from jax.experimental.pallas import tpu as pltpu


def _encoding_kernel(x_ref, w_ref, b_ref, o_ref, acc_ref):
    # x_ref  : (B, S_chunk, D)   input chunk for this grid step
    # w_ref  : (D, H_pad)        weight pre-scaled by 1/S, lane-padded (resident)
    # b_ref  : (1, H_pad)        bias, lane-padded (resident)
    # o_ref  : (B, H_pad)        output (written only on the last step)
    # acc_ref: (B, D) f32        running sequence-sum accumulator (scratch)
    s = pl.program_id(0)

    @pl.when(s == 0)
    def _():
        acc_ref[...] = jnp.zeros_like(acc_ref)

    # Sum over the sequence chunk; the 1/S of the mean is already folded into
    # w_ref, so this is a plain sum accumulated in f32.
    acc_ref[...] += jnp.sum(x_ref[...], axis=1).astype(jnp.float32)

    @pl.when(s == pl.num_programs(0) - 1)
    def _():
        out = (
            jnp.dot(acc_ref[...], w_ref[...], preferred_element_type=jnp.float32)
            + b_ref[...]
        )
        o_ref[...] = out.astype(o_ref.dtype)


def encoding_forward(x, w_enc, b_enc, *, seq_chunk=None):
    """Pallas-backed EncodingFunction.forward.

    x:     (B, S, D_in)
    w_enc: (D_in, H)   PyTorch Linear weight, stored transposed
    b_enc: (H,)        PyTorch Linear bias
    returns (B, H) float32
    """
    B, S, D = x.shape
    H = w_enc.shape[1]

    # Lane-dense kernel output: pad H to a multiple of 128, slice back after.
    H_pad = ((H + 127) // 128) * 128

    # Fold the mean's 1/S into the weight (exact up to fp reassociation).
    w_scaled = w_enc.astype(jnp.float32) * (1.0 / S)
    w_p = jnp.pad(w_scaled, ((0, 0), (0, H_pad - H)))
    b_p = jnp.pad(b_enc.astype(jnp.float32).reshape(1, H), ((0, 0), (0, H_pad - H)))

    # Sequence-chunked reduction keeps the x tile small regardless of S.
    if seq_chunk is None:
        seq_chunk = S if S <= 512 else 512
    assert S % seq_chunk == 0, "seq_len must be a multiple of seq_chunk"
    n_chunks = S // seq_chunk

    out_p = pl.pallas_call(
        _encoding_kernel,
        out_shape=jax.ShapeDtypeStruct((B, H_pad), jnp.float32),
        grid_spec=pltpu.PrefetchScalarGridSpec(
            num_scalar_prefetch=0,
            grid=(n_chunks,),
            in_specs=[
                pl.BlockSpec((B, seq_chunk, D), lambda s: (0, s, 0)),  # pipelined x
                pl.BlockSpec((D, H_pad), lambda s: (0, 0)),            # resident W
                pl.BlockSpec((1, H_pad), lambda s: (0, 0)),            # resident b
            ],
            out_specs=pl.BlockSpec((B, H_pad), lambda s: (0, 0)),
            scratch_shapes=[pltpu.VMEM((B, D), jnp.float32)],
        ),
        compiler_params=pltpu.CompilerParams(
            dimension_semantics=("arbitrary",),  # sequence axis is a reduction
        ),
    )(x, w_p, b_p)

    return out_p[:, :H]


def encoding_reference(x, w_enc, b_enc):
    """Pure-JAX reference mirroring the PyTorch module."""
    x_mean = jnp.mean(x.astype(jnp.float32), axis=1)
    return x_mean @ w_enc + b_enc


if __name__ == "__main__":
    # Small shapes consistent with EncodingFunction(input_dim, hidden_dim).
    batch_size, seq_len = 2, 8
    input_dim, hidden_dim = 16, 32

    key = jax.random.PRNGKey(0)
    kx, k1, k2 = jax.random.split(key, 3)

    x = jax.random.normal(kx, (batch_size, seq_len, input_dim), dtype=jnp.float32)
    # encoder: nn.Linear(input_dim, hidden_dim) — weight stored transposed.
    w_enc = 0.1 * jax.random.normal(k1, (input_dim, hidden_dim), dtype=jnp.float32)
    b_enc = 0.1 * jax.random.normal(k2, (hidden_dim,), dtype=jnp.float32)

    out = encoding_forward(x, w_enc, b_enc)
    out = jax.block_until_ready(out)

    ref = encoding_reference(x, w_enc, b_enc)
    assert out.shape == (batch_size, hidden_dim)
    assert jnp.allclose(out, ref, atol=1e-5, rtol=1e-5), "mismatch vs reference"

    print("KERNEL_OK")
</pallas_src>

<mosaic_0001>
module attributes {stable_mosaic.version = 11 : i64} {
  func.func @_encoding_kernel(%arg0: i32, %arg1: memref<2x8x16xf32, #tpu.memory_space<vmem>>, %arg2: memref<16x128xf32, #tpu.memory_space<vmem>>, %arg3: memref<1x128xf32, #tpu.memory_space<vmem>>, %arg4: memref<2x128xf32, #tpu.memory_space<vmem>>, %arg5: memref<2x16xf32, #tpu.memory_space<vmem>>) attributes {dimension_semantics = [#tpu.dimension_semantics<arbitrary>], iteration_bounds = array<i64: 1>, scalar_prefetch = 0 : i64, scratch_operands = 1 : i64, tpu.core_type = #tpu.core_type<tc>, window_params = [{transform_indices = @transform_0, window_bounds = array<i64: 2, 8, 16>}, {pipeline_mode = #tpu.pipeline_mode<synchronous>, transform_indices = @transform_1, window_bounds = array<i64: 16, 128>}, {pipeline_mode = #tpu.pipeline_mode<synchronous>, transform_indices = @transform_2, window_bounds = array<i64: 1, 128>}, {pipeline_mode = #tpu.pipeline_mode<synchronous>, transform_indices = @transform_3, window_bounds = array<i64: 2, 128>}]} {
    %c0_i32 = arith.constant 0 : i32
    %0 = arith.cmpi eq, %arg0, %c0_i32 : i32
    %1 = arith.extui %0 : i1 to i32
    %c0_i32_0 = arith.constant 0 : i32
    %2 = arith.cmpi ne, %1, %c0_i32_0 : i32
    scf.if %2 {
      %cst_9 = arith.constant 0.000000e+00 : f32
      %11 = vector.broadcast %cst_9 : f32 to vector<2x16xf32>
      %c0_10 = arith.constant 0 : index
      %c0_11 = arith.constant 0 : index
      %12 = vector.load %arg5[%c0_10, %c0_11] : memref<2x16xf32, #tpu.memory_space<vmem>>, vector<2x16xf32>
      tpu.vector_store %arg5[%c0_10, %c0_11], %11 {strides = array<i32>} : memref<2x16xf32, #tpu.memory_space<vmem>>, vector<2x16xf32>,
    } else {
    }
    %c0 = arith.constant 0 : index
    %c0_1 = arith.constant 0 : index
    %3 = vector.load %arg5[%c0, %c0_1] : memref<2x16xf32, #tpu.memory_space<vmem>>, vector<2x16xf32>
    %c0_2 = arith.constant 0 : index
    %c0_3 = arith.constant 0 : index
    %c0_4 = arith.constant 0 : index
    %4 = vector.load %arg1[%c0_2, %c0_3, %c0_4] : memref<2x8x16xf32, #tpu.memory_space<vmem>>, vector<2x8x16xf32>
    %cst = arith.constant dense<0.000000e+00> : vector<2x16xf32>
    %5 = vector.multi_reduction <add>, %4, %cst [1] : vector<2x8x16xf32> to vector<2x16xf32>
    %6 = arith.addf %3, %5 : vector<2x16xf32>
    %c0_5 = arith.constant 0 : index
    %c0_6 = arith.constant 0 : index
    %7 = vector.load %arg5[%c0_5, %c0_6] : memref<2x16xf32, #tpu.memory_space<vmem>>, vector<2x16xf32>
    tpu.vector_store %arg5[%c0_5, %c0_6], %6 {strides = array<i32>} : memref<2x16xf32, #tpu.memory_space<vmem>>, vector<2x16xf32>,
    %c0_i32_7 = arith.constant 0 : i32
    %8 = arith.cmpi eq, %arg0, %c0_i32_7 : i32
    %9 = arith.extui %8 : i1 to i32
    %c0_i32_8 = arith.constant 0 : i32
    %10 = arith.cmpi ne, %9, %c0_i32_8 : i32
    scf.if %10 {
      %c0_9 = arith.constant 0 : index
      %c0_10 = arith.constant 0 : index
      %11 = vector.load %arg5[%c0_9, %c0_10] : memref<2x16xf32, #tpu.memory_space<vmem>>, vector<2x16xf32>
      %c0_11 = arith.constant 0 : index
      %c0_12 = arith.constant 0 : index
      %12 = vector.load %arg2[%c0_11, %c0_12] : memref<16x128xf32, #tpu.memory_space<vmem>>, vector<16x128xf32>
      %cst_13 = arith.constant dense<0.000000e+00> : vector<2x128xf32>
      %13 = tpu.matmul %11, %12, %cst_13 {dimension_numbers = #tpu.dot_dimension_numbers<[1], [0], [0], [1], [0, 0, 1, 1], [], []>} : vector<2x16xf32>, vector<16x128xf32>, vector<2x128xf32> -> vector<2x128xf32>
      %c0_14 = arith.constant 0 : index
      %c0_15 = arith.constant 0 : index
      %14 = vector.load %arg3[%c0_14, %c0_15] : memref<1x128xf32, #tpu.memory_space<vmem>>, vector<1x128xf32>
      %15 = vector.broadcast %14 : vector<1x128xf32> to vector<2x128xf32>
      %16 = arith.addf %13, %15 : vector<2x128xf32>
      %c0_16 = arith.constant 0 : index
      %c0_17 = arith.constant 0 : index
      %17 = vector.load %arg4[%c0_16, %c0_17] : memref<2x128xf32, #tpu.memory_space<vmem>>, vector<2x128xf32>
      tpu.vector_store %arg4[%c0_16, %c0_17], %16 {strides = array<i32>} : memref<2x128xf32, #tpu.memory_space<vmem>>, vector<2x128xf32>,
    } else {
    }
    return
  }
  func.func @transform_0(%arg0: i32) -> (i32, i32, i32) {
    %c0_i32 = arith.constant 0 : i32
    %c0_i32_0 = arith.constant 0 : i32
    %c0_i32_1 = arith.constant 0 : i32
    return %c0_i32, %arg0, %c0_i32_0 : i32, i32, i32
  }
  func.func @transform_1(%arg0: i32) -> (i32, i32) {
    %c0_i32 = arith.constant 0 : i32
    %c0_i32_0 = arith.constant 0 : i32
    %c0_i32_1 = arith.constant 0 : i32
    return %c0_i32, %c0_i32_0 : i32, i32
  }
  func.func @transform_2(%arg0: i32) -> (i32, i32) {
    %c0_i32 = arith.constant 0 : i32
    %c0_i32_0 = arith.constant 0 : i32
    %c0_i32_1 = arith.constant 0 : i32
    return %c0_i32, %c0_i32_0 : i32, i32
  }
  func.func @transform_3(%arg0: i32) -> (i32, i32) {
    %c0_i32 = arith.constant 0 : i32
    %c0_i32_0 = arith.constant 0 : i32
    %c0_i32_1 = arith.constant 0 : i32
    return %c0_i32, %c0_i32_0 : i32, i32
  }
}

</mosaic_0001>

<bundles_post_ra>
// kernel: tpu_custom_call.1
= control target key start
LH: loop header
LB: loop body
LE: loop exit
PB: predicated region body
PF: predicated region fallthrough
CT: control target
= control target key end

     0   :  { %8 = vsyncpa [#allocation4], 0  ;;  %s307_s0 = inlined_call_operand.hbm [shape: f32[2,8,16], index: 0, kind: input, shape index: {}]   ;;  %s308_s1 = inlined_call_operand.hbm [shape: f32[16,128], index: 1, kind: input, shape index: {}]   ;;  %s309_s2 = inlined_call_operand.vmem [shape: f32[1,128], index: 2, kind: input, shape index: {}]   ;;  %s310_s3 = inlined_call_operand.hbm [shape: f32[2,128], index: 3, kind: output, shape index: {}]  }
   0x1   :  { %9 = vsyncpa [#allocation7], 0 }
   0x2   :  { %10 = vsyncpa [#allocation5], 0  ;;  %s263_s12 = smov [#allocation3]  }
   0x3   :  { %s16_s13 = sshll.u32 %s263_s12, 4  ;;  %s17_s13 = int_to_ptr.vmem [resolvable:$true] %s16_s13 }
   0x4   :  { %s205_s14 = scalar_lea.vmem %s17_s13, 256  ;;  %p210_p1 = scmp.lt.s32.totalorder %s17_s13, %s17_s13 }
   0x5   :  { %p206_p0 = scmp.ne.s32.totalorder %s17_s13, %s205_s14  ;;  %p211_p2 = scmp.lt.s32.totalorder %s205_s14, %s205_s14 }
   0x7   :  { %p212_p3 = por %p211_p2, %p210_p1 }
   0x9   :  { %p213_p4 = pnand %p212_p3, %p206_p0 }
   0xb   :  { %216 = shalt.err (!%p213_p4)
}
   0xc   :  { %s264_s15 = smov 128   ;;  %s265_s16 = smov 8  }
   0xd   :  { %22 = dma.hbm_to_vmem [thread:$0]  %s307_s0, 256, %s17_s13, [#allocation4], %s264_s15, %s264_s15, %s265_s16  }
   0xe   :  { %s266_s19 = smov [#allocation6]  }
   0xf   :  { %s28_s20 = sshll.u32 %s266_s19, 4  ;;  %s29_s20 = int_to_ptr.vmem [resolvable:$true] %s28_s20 }
  0x10   :  { %s225_s21 = scalar_lea.vmem %s29_s20, 256  ;;  %p230_p6 = scmp.lt.s32.totalorder %s29_s20, %s29_s20 }
  0x11   :  { %p226_p5 = scmp.ne.s32.totalorder %s29_s20, %s225_s21  ;;  %p231_p7 = scmp.lt.s32.totalorder %s225_s21, %s225_s21 }
  0x13   :  { %p232_p8 = por %p231_p7, %p230_p6 }
  0x15   :  { %p233_p9 = pnand %p232_p8, %p226_p5 }
  0x17   :  { %236 = shalt.err (!%p233_p9)
}
  0x18   :  { %34 = dma.hbm_to_vmem [thread:$0]  %s308_s1, 256, %s29_s20, [#allocation7], %s264_s15, %s264_s15, %s265_s16  }
  0x19   :  { %257 = dma.done.wait [#allocation4], 256  }
  0x1a   :  { %258 = vsyncadd [#allocation4], 4294967040 }
  0x1b   :  { %259 = dma.done.wait [#allocation7], 256  }
  0x1c   :  { %260 = vsyncadd [#allocation7], 4294967040  ;;  %vm47_vm0 = vcmask 123904   ;;  %v267_v0 = vmov 0.0   ;;  %vm268_vm1 = vmmov 0   ;;  %vm52_vm2 = vcmask 130048  }
  0x1d   :  { %48 = vst.msk [vmem:[#allocation2] sm:$0x3] %vm47_vm0, %v267_v0  ;;  %183 = vmatprep.subr.mxu0 %v267_v0  ;;  %187 = vmatprep.mubr.msk.f32.mxu0 %vm268_vm1, %v267_v0  ;;  %v80_v1 = vld [vmem:[#allocation6 + $0x8] sm:$0xff]  ;;  %v79_v2 = vld [vmem:[#allocation6] sm:$0xff]  ;;  %v50_v3 = vld [vmem:[#allocation3] sm:$0xff]  ;;  %vm69_vm3 = vcmask 1041409  }
  0x1e   :  { %184 = vmatpush3.msra.mxu0 %v80_v1  ;;  %v51_v4 = vld [vmem:[#allocation3 + $0x8] sm:$0xff]  ;;  %v53_v5 = vsel %vm52_vm2, %v50_v3, 0.0  ;;  %v178_v23 = vld [vmem:[%s309_s2] ss:$0 sm:$0xff]  ;;  %s269_s24 = smov [#allocation8]  }
  0x1f   :  { %185 = vmatprep.subr.mxu0 %v267_v0  ;;  %v54_v6 = vrot.slane %v53_v5, 4  ;;  %v60_v7 = vsel %vm52_vm2, %v51_v4, 0.0  ;;  %s168_s25 = sshll.u32 %s269_s24, 4  ;;  %s169_s25 = int_to_ptr.vmem [resolvable:$true] %s168_s25 }
  0x20   :  { %186 = vmatpush3.msra.mxu0 %v79_v2  ;;  %v61_v8 = vrot.slane %v60_v7, 4  ;;  %s237_s26 = scalar_lea.vmem %s169_s25, 32  ;;  %p242_p11 = scmp.lt.s32.totalorder %s169_s25, %s169_s25 }
  0x21   :  { %v55_v9 = vadd.f32 %v54_v6, %v53_v5  ;;  %p238_p10 = scmp.ne.s32.totalorder %s169_s25, %s237_s26  ;;  %p243_p12 = scmp.lt.s32.totalorder %s237_s26, %s237_s26 }
  0x22   :  { %v62_v10 = vadd.f32 %v61_v8, %v60_v7 }
  0x23   :  { %v56_v11 = vrot.slane %v55_v9, 2  ;;  %p244_p13 = por %p243_p12, %p242_p11 }
  0x24   :  { %v63_v12 = vrot.slane %v62_v10, 2  ;;  %v49_v18 = vld [vmem:[#allocation2] sm:$0x3] }
  0x25   :  { %v57_v13 = vadd.f32 %v56_v11, %v55_v9  ;;  %p245_p0 = pnand %p244_p13, %p238_p10 }
  0x26   :  { %v64_v14 = vadd.f32 %v63_v12, %v62_v10 }
  0x27   :  { %v58_v15 = vrot.slane %v57_v13, 1 }
  0x28   :  { %v65_v16 = vrot.slane %v64_v14, 1 }
  0x29   :  { %v59_v17 = vadd.f32 %v58_v15, %v57_v13 }
  0x2a   :  { %v66_v19 = vadd.f32 %v65_v16, %v64_v14 }
  0x2c   :  { %v70_v20 = vsel %vm69_vm3, %v66_v19, %v59_v17 }
  0x2d   :  { %v72_v21 = vadd.f32 %v70_v20, %v49_v18 }
  0x2f   :  { %74 = vst.msk [vmem:[#allocation2] sm:$0x3] %vm47_vm0, %v72_v21 }
  0x36   :  { %v78_v22 = vld [vmem:[#allocation2] sm:$0x3] }
  0x37   :  { %188 = vmatmul.mubr.msk.f32.vlgmr.msra.gmra.mxu0 %vm52_vm2, %v78_v22 }
  0xf7   :  { %v157_v24 = vpop.f32.mrf.mxu0 }
  0xf8   :  { %v158_v25 = vadd.f32 %v178_v23, %v157_v24 }
  0xf9   :  { %v189_v26 = vpop.f32.mrf.mxu0 }
  0xfa   :  { %161 = vst [vmem:[#allocation8] sm:$0x3] %v158_v25 }
  0xfb   :  { %248 = shalt.err (!%p245_p0)
}
  0xfc   :  { %171 = dma.vmem_to_hbm [thread:$0]  %s169_s25, 32, %s310_s3, [#allocation5]  }
  0xfd   :  { %261 = dma.done.wait [#allocation5], 32  }
  0xfe   :  { %262 = vsyncadd [#allocation5], 4294967264 }
  0xff   :  { %175 = vsyncpa [#allocation4], 1 }
 0x100   :  { %176 = vsyncpa [#allocation7], 1 }
 0x101   :  { %177 = vsyncpa [#allocation5], 1 }

</bundles_post_ra>
